<compile_context>
chip_gen: v5e
topology: v5e:2x2
jax: 0.10.0
libtpu: 0.0.40
codegen_flags: <defaults>
</compile_context>

<pallas_src>
import functools

import jax
import jax.numpy as jnp
from jax.experimental import pallas as pl
from jax.experimental.pallas import tpu as pltpu

SLICE_LEN = 100  # == input2D.size(2) in the reference module


def _cat_slice_cat_kernel(x1_ref, x2_ref, o_ref, sem, *, c1, c2, s):
    """out = [x1 ; x2 ; (x1;x2)[:, 0:s]] along the channel (middle) axis.

    Everything is issued as HBM->HBM DMA copies; the DMA engines handle the
    strided (channel-sliced) regions, so there is zero compute and zero
    VMEM footprint regardless of shape or dtype.
    """
    s1 = min(s, c1)   # channels of the slice coming from x1
    s2 = s - s1       # channels of the slice coming from x2 (may be 0)

    copies = [
        # v1 = cat([x1, x2], dim=1)
        pltpu.make_async_copy(x1_ref, o_ref.at[:, 0:c1, :], sem.at[0]),
        pltpu.make_async_copy(x2_ref, o_ref.at[:, c1:c1 + c2, :], sem.at[1]),
        # v3 = v1[:, 0:s]  appended after v1
        pltpu.make_async_copy(
            x1_ref.at[:, 0:s1, :],
            o_ref.at[:, c1 + c2:c1 + c2 + s1, :],
            sem.at[2]),
    ]
    if s2 > 0:
        copies.append(
            pltpu.make_async_copy(
                x2_ref.at[:, 0:s2, :],
                o_ref.at[:, c1 + c2 + s1:c1 + c2 + s, :],
                sem.at[3]))

    # Fire all DMAs, then wait on all of them; they overlap on the DMA
    # engines, so the kernel runs at the HBM roofline.
    for cp in copies:
        cp.start()
    for cp in copies:
        cp.wait()


def cat_slice_cat(x1, x2):
    B, C1, W = x1.shape
    B2, C2, W2 = x2.shape
    assert B == B2 and W == W2 and x1.dtype == x2.dtype

    # PyTorch slicing clamps: v3 has min(C1 + C2, 100) channels.
    S = min(C1 + C2, SLICE_LEN)
    out_c = C1 + C2 + S

    kernel = functools.partial(_cat_slice_cat_kernel, c1=C1, c2=C2, s=S)

    return pl.pallas_call(
        kernel,
        out_shape=jax.ShapeDtypeStruct((B, out_c, W), x1.dtype),
        # Leave all arrays in place (HBM): no VMEM tiling limits at all.
        in_specs=[
            pl.BlockSpec(memory_space=pl.ANY),
            pl.BlockSpec(memory_space=pl.ANY),
        ],
        out_specs=pl.BlockSpec(memory_space=pl.ANY),
        scratch_shapes=[pltpu.SemaphoreType.DMA((4,))],
    )(x1, x2)


def _reference(x1, x2):
    v1 = jnp.concatenate([x1, x2], axis=1)
    v3 = v1[:, 0:SLICE_LEN]
    return jnp.concatenate([v1, v3], axis=1)


if __name__ == "__main__":
    key = jax.random.PRNGKey(0)
    k1, k2, k3, k4 = jax.random.split(key, 4)

    # Case 1 (f32): slice spans both inputs (64 channels from x1, 36 from x2).
    B, C1, C2, W = 2, 64, 64, 128
    x1 = jax.random.normal(k1, (B, C1, W), dtype=jnp.float32)
    x2 = jax.random.normal(k2, (B, C2, W), dtype=jnp.float32)
    out = jax.block_until_ready(cat_slice_cat(x1, x2))
    ref = _reference(x1, x2)
    assert out.shape == ref.shape, (out.shape, ref.shape)
    assert jnp.array_equal(out, ref), "f32 mismatch vs reference"

    # Case 2 (bf16): module-like shape (1, 3, 100); slice clamps to C1+C2.
    y1 = jax.random.normal(k3, (1, 3, 100), dtype=jnp.bfloat16)
    y2 = jax.random.normal(k4, (1, 3, 100), dtype=jnp.bfloat16)
    out2 = jax.block_until_ready(cat_slice_cat(y1, y2))
    ref2 = _reference(y1, y2)
    assert out2.shape == ref2.shape, (out2.shape, ref2.shape)
    assert jnp.array_equal(out2, ref2), "bf16 mismatch vs reference"

    print("KERNEL_OK")
</pallas_src>

<mosaic_0001>
module attributes {stable_mosaic.version = 11 : i64} {
  func.func @_cat_slice_cat_kernel(%arg0: memref<2x64x128xf32, #tpu.memory_space<any>>, %arg1: memref<2x64x128xf32, #tpu.memory_space<any>>, %arg2: memref<2x228x128xf32, #tpu.memory_space<any>>, %arg3: memref<4x!tpu.dma_semaphore, #tpu.memory_space<semaphore_mem>>) attributes {dimension_semantics = [], scalar_prefetch = 0 : i64, scratch_operands = 1 : i64, tpu.core_type = #tpu.core_type<tc>} {
    %c0_i32 = arith.constant 0 : i32
    %c0_i32_0 = arith.constant 0 : i32
    %c0_i32_1 = arith.constant 0 : i32
    %c0_i32_2 = arith.constant 0 : i32
    %0 = tpu.memref_slice %arg2[%c0_i32_0, %c0_i32_1, %c0_i32_2] : memref<2x228x128xf32, #tpu.memory_space<any>> -> memref<2x64x128xf32, #tpu.memory_space<any>>
    %1 = tpu.memref_slice %arg3[%c0_i32] : memref<4x!tpu.dma_semaphore, #tpu.memory_space<semaphore_mem>> -> memref<1x!tpu.dma_semaphore, #tpu.memory_space<semaphore_mem>>
    %2 = tpu.memref_squeeze %1 : memref<1x!tpu.dma_semaphore, #tpu.memory_space<semaphore_mem>> -> memref<!tpu.dma_semaphore, #tpu.memory_space<semaphore_mem>>
    tpu.enqueue_dma source(%arg0 : memref<2x64x128xf32, #tpu.memory_space<any>>) target(%0 : memref<2x64x128xf32, #tpu.memory_space<any>>) target_semaphore(%2 : memref<!tpu.dma_semaphore, #tpu.memory_space<semaphore_mem>>)
    %c1_i32 = arith.constant 1 : i32
    %c0_i32_3 = arith.constant 0 : i32
    %c64_i32 = arith.constant 64 : i32
    %c0_i32_4 = arith.constant 0 : i32
    %3 = tpu.memref_slice %arg2[%c0_i32_3, %c64_i32, %c0_i32_4] : memref<2x228x128xf32, #tpu.memory_space<any>> -> memref<2x64x128xf32, #tpu.memory_space<any>>
    %4 = tpu.memref_slice %arg3[%c1_i32] : memref<4x!tpu.dma_semaphore, #tpu.memory_space<semaphore_mem>> -> memref<1x!tpu.dma_semaphore, #tpu.memory_space<semaphore_mem>>
    %5 = tpu.memref_squeeze %4 : memref<1x!tpu.dma_semaphore, #tpu.memory_space<semaphore_mem>> -> memref<!tpu.dma_semaphore, #tpu.memory_space<semaphore_mem>>
    tpu.enqueue_dma source(%arg1 : memref<2x64x128xf32, #tpu.memory_space<any>>) target(%3 : memref<2x64x128xf32, #tpu.memory_space<any>>) target_semaphore(%5 : memref<!tpu.dma_semaphore, #tpu.memory_space<semaphore_mem>>)
    %c2_i32 = arith.constant 2 : i32
    %c0_i32_5 = arith.constant 0 : i32
    %c0_i32_6 = arith.constant 0 : i32
    %c0_i32_7 = arith.constant 0 : i32
    %6 = tpu.memref_slice %arg0[%c0_i32_5, %c0_i32_6, %c0_i32_7] : memref<2x64x128xf32, #tpu.memory_space<any>> -> memref<2x64x128xf32, #tpu.memory_space<any>>
    %c0_i32_8 = arith.constant 0 : i32
    %c128_i32 = arith.constant 128 : i32
    %c0_i32_9 = arith.constant 0 : i32
    %7 = tpu.memref_slice %arg2[%c0_i32_8, %c128_i32, %c0_i32_9] : memref<2x228x128xf32, #tpu.memory_space<any>> -> memref<2x64x128xf32, #tpu.memory_space<any>>
    %8 = tpu.memref_slice %arg3[%c2_i32] : memref<4x!tpu.dma_semaphore, #tpu.memory_space<semaphore_mem>> -> memref<1x!tpu.dma_semaphore, #tpu.memory_space<semaphore_mem>>
    %9 = tpu.memref_squeeze %8 : memref<1x!tpu.dma_semaphore, #tpu.memory_space<semaphore_mem>> -> memref<!tpu.dma_semaphore, #tpu.memory_space<semaphore_mem>>
    tpu.enqueue_dma source(%6 : memref<2x64x128xf32, #tpu.memory_space<any>>) target(%7 : memref<2x64x128xf32, #tpu.memory_space<any>>) target_semaphore(%9 : memref<!tpu.dma_semaphore, #tpu.memory_space<semaphore_mem>>)
    %c3_i32 = arith.constant 3 : i32
    %c0_i32_10 = arith.constant 0 : i32
    %c0_i32_11 = arith.constant 0 : i32
    %c0_i32_12 = arith.constant 0 : i32
    %10 = tpu.memref_slice %arg1[%c0_i32_10, %c0_i32_11, %c0_i32_12] : memref<2x64x128xf32, #tpu.memory_space<any>> -> memref<2x36x128xf32, #tpu.memory_space<any>>
    %c0_i32_13 = arith.constant 0 : i32
    %c192_i32 = arith.constant 192 : i32
    %c0_i32_14 = arith.constant 0 : i32
    %11 = tpu.memref_slice %arg2[%c0_i32_13, %c192_i32, %c0_i32_14] : memref<2x228x128xf32, #tpu.memory_space<any>> -> memref<2x36x128xf32, #tpu.memory_space<any>>
    %12 = tpu.memref_slice %arg3[%c3_i32] : memref<4x!tpu.dma_semaphore, #tpu.memory_space<semaphore_mem>> -> memref<1x!tpu.dma_semaphore, #tpu.memory_space<semaphore_mem>>
    %13 = tpu.memref_squeeze %12 : memref<1x!tpu.dma_semaphore, #tpu.memory_space<semaphore_mem>> -> memref<!tpu.dma_semaphore, #tpu.memory_space<semaphore_mem>>
    tpu.enqueue_dma source(%10 : memref<2x36x128xf32, #tpu.memory_space<any>>) target(%11 : memref<2x36x128xf32, #tpu.memory_space<any>>) target_semaphore(%13 : memref<!tpu.dma_semaphore, #tpu.memory_space<semaphore_mem>>)
    %c0_i32_15 = arith.constant 0 : i32
    %c0_i32_16 = arith.constant 0 : i32
    %c0_i32_17 = arith.constant 0 : i32
    %c0_i32_18 = arith.constant 0 : i32
    %14 = tpu.memref_slice %arg2[%c0_i32_16, %c0_i32_17, %c0_i32_18] : memref<2x228x128xf32, #tpu.memory_space<any>> -> memref<2x64x128xf32, #tpu.memory_space<any>>
    %15 = tpu.memref_slice %arg3[%c0_i32_15] : memref<4x!tpu.dma_semaphore, #tpu.memory_space<semaphore_mem>> -> memref<1x!tpu.dma_semaphore, #tpu.memory_space<semaphore_mem>>
    %16 = tpu.memref_squeeze %15 : memref<1x!tpu.dma_semaphore, #tpu.memory_space<semaphore_mem>> -> memref<!tpu.dma_semaphore, #tpu.memory_space<semaphore_mem>>
    tpu.wait_dma2 semaphore(%16 : memref<!tpu.dma_semaphore, #tpu.memory_space<semaphore_mem>>) src(%arg0 : memref<2x64x128xf32, #tpu.memory_space<any>>) dst(%14 : memref<2x64x128xf32, #tpu.memory_space<any>>)
    %c1_i32_19 = arith.constant 1 : i32
    %c0_i32_20 = arith.constant 0 : i32
    %c64_i32_21 = arith.constant 64 : i32
    %c0_i32_22 = arith.constant 0 : i32
    %17 = tpu.memref_slice %arg2[%c0_i32_20, %c64_i32_21, %c0_i32_22] : memref<2x228x128xf32, #tpu.memory_space<any>> -> memref<2x64x128xf32, #tpu.memory_space<any>>
    %18 = tpu.memref_slice %arg3[%c1_i32_19] : memref<4x!tpu.dma_semaphore, #tpu.memory_space<semaphore_mem>> -> memref<1x!tpu.dma_semaphore, #tpu.memory_space<semaphore_mem>>
    %19 = tpu.memref_squeeze %18 : memref<1x!tpu.dma_semaphore, #tpu.memory_space<semaphore_mem>> -> memref<!tpu.dma_semaphore, #tpu.memory_space<semaphore_mem>>
    tpu.wait_dma2 semaphore(%19 : memref<!tpu.dma_semaphore, #tpu.memory_space<semaphore_mem>>) src(%arg1 : memref<2x64x128xf32, #tpu.memory_space<any>>) dst(%17 : memref<2x64x128xf32, #tpu.memory_space<any>>)
    %c2_i32_23 = arith.constant 2 : i32
    %c0_i32_24 = arith.constant 0 : i32
    %c0_i32_25 = arith.constant 0 : i32
    %c0_i32_26 = arith.constant 0 : i32
    %20 = tpu.memref_slice %arg0[%c0_i32_24, %c0_i32_25, %c0_i32_26] : memref<2x64x128xf32, #tpu.memory_space<any>> -> memref<2x64x128xf32, #tpu.memory_space<any>>
    %c0_i32_27 = arith.constant 0 : i32
    %c128_i32_28 = arith.constant 128 : i32
    %c0_i32_29 = arith.constant 0 : i32
    %21 = tpu.memref_slice %arg2[%c0_i32_27, %c128_i32_28, %c0_i32_29] : memref<2x228x128xf32, #tpu.memory_space<any>> -> memref<2x64x128xf32, #tpu.memory_space<any>>
    %22 = tpu.memref_slice %arg3[%c2_i32_23] : memref<4x!tpu.dma_semaphore, #tpu.memory_space<semaphore_mem>> -> memref<1x!tpu.dma_semaphore, #tpu.memory_space<semaphore_mem>>
    %23 = tpu.memref_squeeze %22 : memref<1x!tpu.dma_semaphore, #tpu.memory_space<semaphore_mem>> -> memref<!tpu.dma_semaphore, #tpu.memory_space<semaphore_mem>>
    tpu.wait_dma2 semaphore(%23 : memref<!tpu.dma_semaphore, #tpu.memory_space<semaphore_mem>>) src(%20 : memref<2x64x128xf32, #tpu.memory_space<any>>) dst(%21 : memref<2x64x128xf32, #tpu.memory_space<any>>)
    %c3_i32_30 = arith.constant 3 : i32
    %c0_i32_31 = arith.constant 0 : i32
    %c0_i32_32 = arith.constant 0 : i32
    %c0_i32_33 = arith.constant 0 : i32
    %24 = tpu.memref_slice %arg1[%c0_i32_31, %c0_i32_32, %c0_i32_33] : memref<2x64x128xf32, #tpu.memory_space<any>> -> memref<2x36x128xf32, #tpu.memory_space<any>>
    %c0_i32_34 = arith.constant 0 : i32
    %c192_i32_35 = arith.constant 192 : i32
    %c0_i32_36 = arith.constant 0 : i32
    %25 = tpu.memref_slice %arg2[%c0_i32_34, %c192_i32_35, %c0_i32_36] : memref<2x228x128xf32, #tpu.memory_space<any>> -> memref<2x36x128xf32, #tpu.memory_space<any>>
    %26 = tpu.memref_slice %arg3[%c3_i32_30] : memref<4x!tpu.dma_semaphore, #tpu.memory_space<semaphore_mem>> -> memref<1x!tpu.dma_semaphore, #tpu.memory_space<semaphore_mem>>
    %27 = tpu.memref_squeeze %26 : memref<1x!tpu.dma_semaphore, #tpu.memory_space<semaphore_mem>> -> memref<!tpu.dma_semaphore, #tpu.memory_space<semaphore_mem>>
    tpu.wait_dma2 semaphore(%27 : memref<!tpu.dma_semaphore, #tpu.memory_space<semaphore_mem>>) src(%24 : memref<2x36x128xf32, #tpu.memory_space<any>>) dst(%25 : memref<2x36x128xf32, #tpu.memory_space<any>>)
    return
  }
}

</mosaic_0001>

<bundles_post_ra>
// kernel: tpu_custom_call.1
= control target key start
LH: loop header
LB: loop body
LE: loop exit
PB: predicated region body
PF: predicated region fallthrough
CT: control target
= control target key end

     0   :  { %s196_s18 = smov 1024   ;;  %s197_s19 = smov 3712   ;;  %s233_s0 = inlined_call_operand.hbm [shape: f32[2,64,128], index: 0, kind: input, shape index: {}]   ;;  %s234_s2 = inlined_call_operand.vmem [shape: f32[2,228,128], index: 2, kind: output, shape index: {}]   ;;  %s235_s1 = inlined_call_operand.hbm [shape: f32[2,64,128], index: 1, kind: input, shape index: {}]  }
   0x1   :  { %s7_s11 = sshll.u32 %s233_s0, 4  ;;  %s9_s14 = sshll.u32 %s234_s2, 4  ;;  %s8_s11 = int_to_ptr.hbm [resolvable:$true] %s7_s11  ;;  %s10_s14 = int_to_ptr.vmem [resolvable:$true] %s9_s14 }
   0x2   :  { %s15_s17 = scalar_lea.vmem %s234_s2, 64  ;;  %s198_s20 = smov 64  }
   0x3   :  { %14 = dma.hbm_to_vmem [thread:$0]  %s8_s11, 2048, %s10_s14, [#allocation2], %s196_s18, %s197_s19, %s198_s20 }
   0x4   :  { %s17_s23 = sshll.u32 %s235_s1, 4  ;;  %s19_s24 = sshll.u32 %s15_s17, 4  ;;  %s18_s23 = int_to_ptr.hbm [resolvable:$true] %s17_s23  ;;  %s20_s24 = int_to_ptr.vmem [resolvable:$true] %s19_s24 }
   0x5   :  { %24 = dma.hbm_to_vmem [thread:$0]  %s18_s23, 2048, %s20_s24, [#allocation2 + $0x1], %s196_s18, %s197_s19, %s198_s20 }
   0x6   :  { %s25_s26 = scalar_lea.vmem %s234_s2, 128  ;;  %s35_s29 = scalar_lea.vmem %s234_s2, 192 }
   0x7   :  { %s29_s30 = sshll.u32 %s25_s26, 4  ;;  %s39_s3 = sshll.u32 %s35_s29, 4  ;;  %s30_s30 = int_to_ptr.vmem [resolvable:$true] %s29_s30  ;;  %s40_s3 = int_to_ptr.vmem [resolvable:$true] %s39_s3 }
   0x8   :  { %34 = dma.hbm_to_vmem [thread:$0]  %s8_s11, 2048, %s30_s30, [#allocation2 + $0x2], %s196_s18, %s197_s19, %s198_s20 }
   0x9   :  { %s199_s4 = smov 36  }
   0xa   :  { %44 = dma.hbm_to_vmem [thread:$0]  %s18_s23, 1152, %s40_s3, [#allocation2 + $0x3], %s196_s18, %s197_s19, %s199_s4 }
   0xb   :  { %188 = dma.done.wait [#allocation2], 2048 }
   0xc   :  { %189 = vsyncadd [#allocation2], 4294965248 }
   0xd   :  { %190 = dma.done.wait [#allocation2 + $0x1], 2048 }
   0xe   :  { %191 = vsyncadd [#allocation2 + $0x1], 4294965248 }
   0xf   :  { %192 = dma.done.wait [#allocation2 + $0x2], 2048 }
  0x10   :  { %193 = vsyncadd [#allocation2 + $0x2], 4294965248 }
  0x11   :  { %194 = dma.done.wait [#allocation2 + $0x3], 1152 }
  0x12   :  { %195 = vsyncadd [#allocation2 + $0x3], 4294966144 }
  0x13   :  { %57 = vsyncmov [#allocation2] }
  0x16   :  { %s58_s1 = vpop.sfrf %57 }
  0x17   :  { %p84_p0 = scmp.ne.s32.totalorder %s58_s1, 0 }
  0x19   :  { %62 = shalt.err (%p84_p0)  }
  0x1a   :  { %64 = vsyncmov [#allocation2 + $0x1] }
  0x1d   :  { %s65_s2 = vpop.sfrf %64 }
  0x1e   :  { %p85_p1 = scmp.ne.s32.totalorder %s65_s2, 0 }
  0x20   :  { %69 = shalt.err (%p85_p1)  }
  0x21   :  { %71 = vsyncmov [#allocation2 + $0x2] }
  0x24   :  { %s72_s5 = vpop.sfrf %71 }
  0x25   :  { %p86_p2 = scmp.ne.s32.totalorder %s72_s5, 0 }
  0x27   :  { %76 = shalt.err (%p86_p2)  }
  0x28   :  { %78 = vsyncmov [#allocation2 + $0x3] }
  0x2b   :  { %s79_s6 = vpop.sfrf %78 }
  0x2c   :  { %p87_p3 = scmp.ne.s32.totalorder %s79_s6, 0 }
  0x2e   :  { %83 = shalt.err (%p87_p3)  }

</bundles_post_ra>
